<compile_context>
chip_gen: v7x
topology: tpu7x:2x2x1
jax: 0.10.0
libtpu: 0.0.40
codegen_flags: <defaults>
</compile_context>

<pallas_src>
import functools
import math

import jax
import jax.numpy as jnp
from jax import lax
from jax.experimental import pallas as pl
from jax.experimental.pallas import tpu as pltpu


# ------------------------------- kernel body --------------------------------

def _mma_kernel(xq_ref, k_ref, v_ref, wq_ref, bq_ref, wf_ref, pvec_ref,
                out_ref, acc_ref, *xcd_scratch,
                head_dim, group_size, compute_dtype, cast_x):
    """One (batch, query-tile, head-group) grid step.

    xq_ref  : (1, tq, D)      query rows of x (also the residual)
    k_ref   : (1, G, S, hd)   pre-projected keys for this head group (cd)
    v_ref   : (1, G, S, hd)   pre-projected values for this head group (cd)
    wq_ref  : (1, D, G*hd)    Q weights with 1/sqrt(hd) folded in (cd)
    bq_ref  : (1, 1, G*hd)    Q bias   with 1/sqrt(hd) folded in (f32)
    wf_ref  : (1, G*hd, D)    output-projection rows for this group (cd)
    pvec_ref: (3, D)          rows = [bf, gamma, beta] (f32)
    out_ref : (1, tq, D)
    acc_ref : VMEM (tq, D) f32 accumulator over head groups
    xcd_scratch (optional): VMEM (tq, D) compute-dtype query rows, cast once
    """
    gi = pl.program_id(2)
    hd = head_dim
    G = group_size
    cd = compute_dtype
    f32 = jnp.float32

    @pl.when(gi == 0)
    def _init():
        acc_ref[...] = jnp.zeros_like(acc_ref)
        if cast_x:
            # cast the query rows once per (batch, q-tile), not once per group
            xcd_scratch[0][...] = xq_ref[0].astype(cd)

    xq_c = xcd_scratch[0][...] if cast_x else xq_ref[0]          # (tq, D)

    # Grouped Q projection: one wide MXU matmul (contraction D, width G*hd).
    # Softmax scale is pre-folded into wq / bq on the host side.
    q = jnp.dot(xq_c, wq_ref[0], preferred_element_type=f32) + bq_ref[0]

    ctx_parts = []
    for g in range(G):                      # G is small & static -> unrolled
        q_h = q[:, g * hd:(g + 1) * hd].astype(cd)               # (tq, hd)
        k_h = k_ref[0, g]                                        # (S, hd), cd
        v_h = v_ref[0, g]                                        # (S, hd), cd
        # scores q @ k^T via dot_general (no materialized transpose)
        s = lax.dot_general(q_h, k_h,
                            dimension_numbers=(((1,), (1,)), ((), ())),
                            preferred_element_type=f32)          # (tq, S)
        # numerically-stable softmax; normalization deferred past the PV dot
        m = jnp.max(s, axis=-1, keepdims=True)
        p = jnp.exp(s - m)
        l = jnp.sum(p, axis=-1, keepdims=True)
        ctx = jnp.dot(p.astype(cd), v_h, preferred_element_type=f32)  # (tq,hd)
        ctx_parts.append(ctx / l)           # exact (tq,1) divide, post-PV
    ctx_g = ctx_parts[0] if G == 1 else jnp.concatenate(ctx_parts, axis=-1)

    # This group's contribution to the output projection (contraction G*hd).
    acc_ref[...] += jnp.dot(ctx_g.astype(cd), wf_ref[0],
                            preferred_element_type=f32)          # (tq, D)

    @pl.when(gi == pl.num_programs(2) - 1)
    def _finalize():
        pvec = pvec_ref[...]                      # (3, D): bf, gamma, beta
        z = xq_ref[0].astype(f32) + acc_ref[...] + pvec[0:1, :]
        # two-pass LayerNorm (no E[x^2]-E[x]^2 cancellation risk)
        mean = jnp.mean(z, axis=-1, keepdims=True)
        zc = z - mean
        var = jnp.mean(zc * zc, axis=-1, keepdims=True)
        norm = zc * lax.rsqrt(var + 1e-5)
        out_ref[0] = (norm * pvec[1:2, :] + pvec[2:3, :]).astype(out_ref.dtype)


# ----------------------------- host-side helpers ----------------------------

def _pick_group_size(n_heads, head_dim, target):
    """Largest G dividing n_heads with G*head_dim <= target (at least 1)."""
    best = 1
    for g in range(1, n_heads + 1):
        if n_heads % g == 0 and g * head_dim <= target:
            best = g
    return best


def _pick_q_tile(S, B):
    """Query tile: big enough to amortize step overhead, small enough to keep
    the (tq, S) score intermediates bounded, and (when B == 1) leaving >= 2
    query tiles so both v7x TensorCores get parallel work."""
    t = S
    if S > 512:
        for c in (512, 256, 128):
            if S % c == 0:
                t = c
                break
    if B == 1 and t == S and S % 2 == 0 and (S // 2) % 8 == 0:
        t = S // 2
    return t


def _vmem_limit_bytes():
    """Device-aware scoped-VMEM budget with headroom (v7x only has 64 MiB)."""
    mib = 1024 * 1024
    try:
        cap = int(pltpu.get_tpu_info().vmem_capacity_bytes)
        return int(min(max(cap - 16 * mib, 32 * mib), 100 * mib))
    except Exception:
        return 48 * mib


def pack_mma_params(params, *, n_heads, compute_dtype=None, group_target=256):
    """One-time repack of the module parameters for the Pallas kernel.

    Call once at init and reuse across forward calls (hoists the per-group
    reshape / transpose / scale folding / dtype casts out of the forward).
    group_target ~ 256 fills the v6e/v7x MXU; use 128 for v5e.
    """
    D = params["wq"].shape[0]
    assert D % n_heads == 0, "d_model must be divisible by n_heads"
    hd = D // n_heads
    cd = (jnp.dtype(compute_dtype) if compute_dtype is not None
          else params["wq"].dtype)
    G = _pick_group_size(n_heads, hd, group_target)
    HG = n_heads // G
    ghd = G * hd
    inv_scale = 1.0 / math.sqrt(hd)

    packed = {
        # Q per head-group, softmax scale folded into weight and bias
        "wq_g": (params["wq"].reshape(D, HG, ghd).transpose(1, 0, 2)
                 * inv_scale).astype(cd),                          # (HG, D, ghd)
        "bq_g": (params["bq"].reshape(1, HG, ghd).transpose(1, 0, 2)
                 * inv_scale).astype(jnp.float32),                 # (HG, 1, ghd)
        # output projection rows per head-group
        "wf_g": params["wf"].reshape(HG, ghd, D).astype(cd),       # (HG, ghd, D)
        # K/V projection weights kept whole (one XLA GEMM per call);
        # K bias dropped: a constant key bias cancels in softmax.
        "wk_cd": params["wk"].astype(cd),
        "wv_cd": params["wv"].astype(cd),
        "bv": params["bv"].astype(jnp.float32),
        # bf / gamma / beta packed into one tiny (3, D) DMA
        "pvec": jnp.concatenate([params["bf"], params["gamma"], params["beta"]],
                                axis=0).astype(jnp.float32),
    }
    return packed


def multimodal_attention(x, packed, *, n_heads, q_tile=None):
    """Eval-mode forward of MultiModalAttention.  x: (B, S, D)."""
    B, S, D = x.shape
    assert D % n_heads == 0
    hd = D // n_heads
    ghd = packed["wq_g"].shape[-1]
    G = ghd // hd
    HG = n_heads // G
    cd = packed["wq_g"].dtype
    cast_x = (x.dtype != cd)
    f32 = jnp.float32

    tq = q_tile if q_tile is not None else _pick_q_tile(S, B)
    assert S % tq == 0, "query tile must divide seq_len"
    nq = S // tq

    # ---- K / V projections: one full-width XLA GEMM each, computed once per
    # call and laid out per head (B, H, S, hd) so the kernel never recomputes
    # them per query tile and never lane-slices an unaligned K|V buffer.
    x_cd = x.astype(cd)
    k_full = jnp.dot(x_cd, packed["wk_cd"], preferred_element_type=f32)
    v_full = jnp.dot(x_cd, packed["wv_cd"], preferred_element_type=f32) + packed["bv"]
    k_heads = k_full.reshape(B, S, n_heads, hd).transpose(0, 2, 1, 3).astype(cd)
    v_heads = v_full.reshape(B, S, n_heads, hd).transpose(0, 2, 1, 3).astype(cd)

    kernel = functools.partial(_mma_kernel, head_dim=hd, group_size=G,
                               compute_dtype=cd, cast_x=cast_x)

    scratch = [pltpu.VMEM((tq, D), jnp.float32)]       # output-proj accumulator
    if cast_x:
        scratch.append(pltpu.VMEM((tq, D), cd))        # query rows cast once

    return pl.pallas_call(
        kernel,
        out_shape=jax.ShapeDtypeStruct((B, S, D), x.dtype),
        grid_spec=pltpu.PrefetchScalarGridSpec(
            num_scalar_prefetch=0,
            grid=(B, nq, HG),
            in_specs=[
                pl.BlockSpec((1, tq, D), lambda b, qi, gi: (b, qi, 0)),        # x (queries + residual)
                pl.BlockSpec((1, G, S, hd), lambda b, qi, gi: (b, gi, 0, 0)),  # K per head-group
                pl.BlockSpec((1, G, S, hd), lambda b, qi, gi: (b, gi, 0, 0)),  # V per head-group
                pl.BlockSpec((1, D, ghd), lambda b, qi, gi: (gi, 0, 0)),       # wq per group
                pl.BlockSpec((1, 1, ghd), lambda b, qi, gi: (gi, 0, 0)),       # bq per group
                pl.BlockSpec((1, ghd, D), lambda b, qi, gi: (gi, 0, 0)),       # wf per group
                pl.BlockSpec((3, D), lambda b, qi, gi: (0, 0)),                # bf/gamma/beta
            ],
            out_specs=pl.BlockSpec((1, tq, D), lambda b, qi, gi: (b, qi, 0)),
            scratch_shapes=scratch,
        ),
        compiler_params=pltpu.CompilerParams(
            dimension_semantics=("parallel", "parallel", "arbitrary"),
            vmem_limit_bytes=_vmem_limit_bytes(),
        ),
    )(x, k_heads, v_heads, packed["wq_g"], packed["bq_g"], packed["wf_g"],
      packed["pvec"])


# ----------------------------- reference & test -----------------------------

def _xavier_uniform(key, fan_in, fan_out, dtype=jnp.float32):
    bound = math.sqrt(6.0 / (fan_in + fan_out))
    return jax.random.uniform(key, (fan_in, fan_out), dtype,
                              minval=-bound, maxval=bound)


def _reference(x, p, n_heads):
    """Pure-JAX reference matching the PyTorch forward (eval mode, no mask)."""
    B, S, D = x.shape
    hd = D // n_heads
    residual = x
    q = x @ p["wq"] + p["bq"]
    k = x @ p["wk"] + p["bk"]
    v = x @ p["wv"] + p["bv"]
    q = q.reshape(B, S, n_heads, hd).transpose(0, 2, 1, 3)
    k = k.reshape(B, S, n_heads, hd).transpose(0, 2, 1, 3)
    v = v.reshape(B, S, n_heads, hd).transpose(0, 2, 1, 3)
    energy = jnp.einsum("bhqd,bhkd->bhqk", q, k) / math.sqrt(hd)
    attn = jax.nn.softmax(energy, axis=-1)
    ctx = jnp.einsum("bhqk,bhkd->bhqd", attn, v)
    ctx = ctx.transpose(0, 2, 1, 3).reshape(B, S, D)
    y = ctx @ p["wf"] + p["bf"]
    z = residual + y
    mean = jnp.mean(z, axis=-1, keepdims=True)
    var = jnp.mean((z - mean) ** 2, axis=-1, keepdims=True)
    return (z - mean) / jnp.sqrt(var + 1e-5) * p["gamma"] + p["beta"]


if __name__ == "__main__":
    # small shapes consistent with the module
    B, S, D, H = 2, 8, 32, 4

    key = jax.random.PRNGKey(0)
    keys = jax.random.split(key, 12)
    kx, kq, kk, kv, kf, kbq, kbk, kbv, kbf, kg, kb, kx2 = keys

    x = jax.random.normal(kx, (B, S, D), jnp.float32)

    # non-trivial biases / affine params to exercise every code path
    # (nonzero bk also verifies that dropping the K bias is exact in softmax)
    params = {
        "wq": _xavier_uniform(kq, D, D),
        "bq": 0.05 * jax.random.normal(kbq, (1, D), jnp.float32),
        "wk": _xavier_uniform(kk, D, D),
        "bk": 0.05 * jax.random.normal(kbk, (1, D), jnp.float32),
        "wv": _xavier_uniform(kv, D, D),
        "bv": 0.05 * jax.random.normal(kbv, (1, D), jnp.float32),
        "wf": _xavier_uniform(kf, D, D),
        "bf": 0.05 * jax.random.normal(kbf, (1, D), jnp.float32),
        "gamma": 1.0 + 0.1 * jax.random.normal(kg, (1, D), jnp.float32),
        "beta": 0.1 * jax.random.normal(kb, (1, D), jnp.float32),
    }

    ref = _reference(x, params, H)

    # f32 compute path (all heads fit one group: G=4, HG=1)
    packed_f32 = pack_mma_params(params, n_heads=H)
    out = jax.block_until_ready(multimodal_attention(x, packed_f32, n_heads=H))
    assert out.shape == (B, S, D)
    assert jnp.allclose(out, ref, atol=2e-2, rtol=2e-2), "f32 path mismatch"

    # bf16 MXU-input path (f32 accumulation) - looser tolerance
    packed_bf16 = pack_mma_params(params, n_heads=H, compute_dtype=jnp.bfloat16)
    out_bf16 = jax.block_until_ready(
        multimodal_attention(x, packed_bf16, n_heads=H))
    assert jnp.allclose(out_bf16, ref, atol=1e-1, rtol=1e-1), "bf16 path mismatch"

    # multi-group accumulation (HG=2) + query tiling (nq=2) + B==1 megacore split
    B2, S2 = 1, 16
    x2 = jax.random.normal(kx2, (B2, S2, D), jnp.float32)
    ref2 = _reference(x2, params, H)
    packed_grp = pack_mma_params(params, n_heads=H, group_target=16)  # G=2, HG=2
    out2 = jax.block_until_ready(multimodal_attention(x2, packed_grp, n_heads=H))
    assert out2.shape == (B2, S2, D)
    assert jnp.allclose(out2, ref2, atol=2e-2, rtol=2e-2), "grouped path mismatch"

    print("KERNEL_OK")
</pallas_src>

<mosaic_0001>
module attributes {stable_mosaic.version = 11 : i64} {
  func.func @_mma_kernel(%arg0: i32, %arg1: i32, %arg2: i32, %arg3: memref<1x8x32xf32, #tpu.memory_space<vmem>>, %arg4: memref<1x4x8x8xf32, #tpu.memory_space<vmem>>, %arg5: memref<1x4x8x8xf32, #tpu.memory_space<vmem>>, %arg6: memref<1x32x32xf32, #tpu.memory_space<vmem>>, %arg7: memref<1x1x32xf32, #tpu.memory_space<vmem>>, %arg8: memref<1x32x32xf32, #tpu.memory_space<vmem>>, %arg9: memref<3x32xf32, #tpu.memory_space<vmem>>, %arg10: memref<1x8x32xf32, #tpu.memory_space<vmem>>, %arg11: memref<8x32xf32, #tpu.memory_space<vmem>>) attributes {dimension_semantics = [#tpu.dimension_semantics<parallel>, #tpu.dimension_semantics<parallel>, #tpu.dimension_semantics<arbitrary>], iteration_bounds = array<i64: 2, 1, 1>, scalar_prefetch = 0 : i64, scratch_operands = 1 : i64, tpu.core_type = #tpu.core_type<tc>, window_params = [{transform_indices = @transform_0, window_bounds = array<i64: 1, 8, 32>}, {transform_indices = @transform_1, window_bounds = array<i64: 1, 4, 8, 8>}, {transform_indices = @transform_2, window_bounds = array<i64: 1, 4, 8, 8>}, {transform_indices = @transform_3, window_bounds = array<i64: 1, 32, 32>}, {transform_indices = @transform_4, window_bounds = array<i64: 1, 1, 32>}, {transform_indices = @transform_5, window_bounds = array<i64: 1, 32, 32>}, {pipeline_mode = #tpu.pipeline_mode<synchronous>, transform_indices = @transform_6, window_bounds = array<i64: 3, 32>}, {transform_indices = @transform_7, window_bounds = array<i64: 1, 8, 32>}]} {
    %c0_i32 = arith.constant 0 : i32
    %0 = arith.cmpi eq, %arg2, %c0_i32 : i32
    %1 = arith.extui %0 : i1 to i32
    %c0_i32_0 = arith.constant 0 : i32
    %2 = arith.cmpi ne, %1, %c0_i32_0 : i32
    scf.if %2 {
      %cst_64 = arith.constant 0.000000e+00 : f32
      %86 = vector.broadcast %cst_64 : f32 to vector<8x32xf32>
      %c0_65 = arith.constant 0 : index
      %c0_66 = arith.constant 0 : index
      %87 = vector.load %arg11[%c0_65, %c0_66] : memref<8x32xf32, #tpu.memory_space<vmem>>, vector<8x32xf32>
      tpu.vector_store %arg11[%c0_65, %c0_66], %86 {strides = array<i32>} : memref<8x32xf32, #tpu.memory_space<vmem>>, vector<8x32xf32>,
    } else {
    }
    %c0 = arith.constant 0 : index
    %c0_1 = arith.constant 0 : index
    %c0_2 = arith.constant 0 : index
    %3 = vector.load %arg3[%c0, %c0_1, %c0_2] : memref<1x8x32xf32, #tpu.memory_space<vmem>>, vector<1x8x32xf32>
    %4 = vector.shape_cast %3 : vector<1x8x32xf32> to vector<8x32xf32>
    %c0_3 = arith.constant 0 : index
    %c0_4 = arith.constant 0 : index
    %c0_5 = arith.constant 0 : index
    %5 = vector.load %arg6[%c0_3, %c0_4, %c0_5] : memref<1x32x32xf32, #tpu.memory_space<vmem>>, vector<1x32x32xf32>
    %6 = vector.shape_cast %5 : vector<1x32x32xf32> to vector<32x32xf32>
    %cst = arith.constant dense<0.000000e+00> : vector<8x32xf32>
    %7 = tpu.matmul %4, %6, %cst {dimension_numbers = #tpu.dot_dimension_numbers<[1], [0], [0], [1], [0, 0, 1, 1], [], []>} : vector<8x32xf32>, vector<32x32xf32>, vector<8x32xf32> -> vector<8x32xf32>
    %c0_6 = arith.constant 0 : index
    %c0_7 = arith.constant 0 : index
    %c0_8 = arith.constant 0 : index
    %8 = vector.load %arg7[%c0_6, %c0_7, %c0_8] : memref<1x1x32xf32, #tpu.memory_space<vmem>>, vector<1x1x32xf32>
    %9 = vector.shape_cast %8 : vector<1x1x32xf32> to vector<1x32xf32>
    %10 = vector.broadcast %9 : vector<1x32xf32> to vector<8x32xf32>
    %11 = arith.addf %7, %10 : vector<8x32xf32>
    %12 = vector.extract_strided_slice %11 {offsets = [0, 0], sizes = [8, 8], strides = [1, 1]} : vector<8x32xf32> to vector<8x8xf32>
    %c0_9 = arith.constant 0 : index
    %c0_10 = arith.constant 0 : index
    %c0_11 = arith.constant 0 : index
    %c0_12 = arith.constant 0 : index
    %13 = vector.load %arg4[%c0_9, %c0_10, %c0_11, %c0_12] : memref<1x4x8x8xf32, #tpu.memory_space<vmem>>, vector<1x1x8x8xf32>
    %14 = vector.shape_cast %13 : vector<1x1x8x8xf32> to vector<8x8xf32>
    %c0_13 = arith.constant 0 : index
    %c0_14 = arith.constant 0 : index
    %c0_15 = arith.constant 0 : index
    %c0_16 = arith.constant 0 : index
    %15 = vector.load %arg5[%c0_13, %c0_14, %c0_15, %c0_16] : memref<1x4x8x8xf32, #tpu.memory_space<vmem>>, vector<1x1x8x8xf32>
    %16 = vector.shape_cast %15 : vector<1x1x8x8xf32> to vector<8x8xf32>
    %cst_17 = arith.constant dense<0.000000e+00> : vector<8x8xf32>
    %17 = tpu.matmul %12, %14, %cst_17 {dimension_numbers = #tpu.dot_dimension_numbers<[1], [1], [0], [0], [0, 0, 1, 0], [], []>} : vector<8x8xf32>, vector<8x8xf32>, vector<8x8xf32> -> vector<8x8xf32>
    %cst_18 = arith.constant dense<0xFF800000> : vector<8xf32>
    %18 = vector.multi_reduction <maximumf>, %17, %cst_18 [1] : vector<8x8xf32> to vector<8xf32>
    %19 = vector.shape_cast %18 : vector<8xf32> to vector<8x1xf32>
    %20 = vector.broadcast %19 : vector<8x1xf32> to vector<8x8xf32>
    %21 = arith.subf %17, %20 : vector<8x8xf32>
    %22 = math.exp %21 : vector<8x8xf32>
    %cst_19 = arith.constant dense<0.000000e+00> : vector<8xf32>
    %23 = vector.multi_reduction <add>, %22, %cst_19 [1] : vector<8x8xf32> to vector<8xf32>
    %24 = vector.shape_cast %23 : vector<8xf32> to vector<8x1xf32>
    %cst_20 = arith.constant dense<0.000000e+00> : vector<8x8xf32>
    %25 = tpu.matmul %22, %16, %cst_20 {dimension_numbers = #tpu.dot_dimension_numbers<[1], [0], [0], [1], [0, 0, 1, 1], [], []>} : vector<8x8xf32>, vector<8x8xf32>, vector<8x8xf32> -> vector<8x8xf32>
    %26 = vector.broadcast %24 : vector<8x1xf32> to vector<8x8xf32>
    %27 = arith.divf %25, %26 : vector<8x8xf32>
    %28 = vector.extract_strided_slice %11 {offsets = [0, 8], sizes = [8, 8], strides = [1, 1]} : vector<8x32xf32> to vector<8x8xf32>
    %c0_21 = arith.constant 0 : index
    %c1 = arith.constant 1 : index
    %c0_22 = arith.constant 0 : index
    %c0_23 = arith.constant 0 : index
    %29 = vector.load %arg4[%c0_21, %c1, %c0_22, %c0_23] : memref<1x4x8x8xf32, #tpu.memory_space<vmem>>, vector<1x1x8x8xf32>
    %30 = vector.shape_cast %29 : vector<1x1x8x8xf32> to vector<8x8xf32>
    %c0_24 = arith.constant 0 : index
    %c1_25 = arith.constant 1 : index
    %c0_26 = arith.constant 0 : index
    %c0_27 = arith.constant 0 : index
    %31 = vector.load %arg5[%c0_24, %c1_25, %c0_26, %c0_27] : memref<1x4x8x8xf32, #tpu.memory_space<vmem>>, vector<1x1x8x8xf32>
    %32 = vector.shape_cast %31 : vector<1x1x8x8xf32> to vector<8x8xf32>
    %cst_28 = arith.constant dense<0.000000e+00> : vector<8x8xf32>
    %33 = tpu.matmul %28, %30, %cst_28 {dimension_numbers = #tpu.dot_dimension_numbers<[1], [1], [0], [0], [0, 0, 1, 0], [], []>} : vector<8x8xf32>, vector<8x8xf32>, vector<8x8xf32> -> vector<8x8xf32>
    %cst_29 = arith.constant dense<0xFF800000> : vector<8xf32>
    %34 = vector.multi_reduction <maximumf>, %33, %cst_29 [1] : vector<8x8xf32> to vector<8xf32>
    %35 = vector.shape_cast %34 : vector<8xf32> to vector<8x1xf32>
    %36 = vector.broadcast %35 : vector<8x1xf32> to vector<8x8xf32>
    %37 = arith.subf %33, %36 : vector<8x8xf32>
    %38 = math.exp %37 : vector<8x8xf32>
    %cst_30 = arith.constant dense<0.000000e+00> : vector<8xf32>
    %39 = vector.multi_reduction <add>, %38, %cst_30 [1] : vector<8x8xf32> to vector<8xf32>
    %40 = vector.shape_cast %39 : vector<8xf32> to vector<8x1xf32>
    %cst_31 = arith.constant dense<0.000000e+00> : vector<8x8xf32>
    %41 = tpu.matmul %38, %32, %cst_31 {dimension_numbers = #tpu.dot_dimension_numbers<[1], [0], [0], [1], [0, 0, 1, 1], [], []>} : vector<8x8xf32>, vector<8x8xf32>, vector<8x8xf32> -> vector<8x8xf32>
    %42 = vector.broadcast %40 : vector<8x1xf32> to vector<8x8xf32>
    %43 = arith.divf %41, %42 : vector<8x8xf32>
    %44 = vector.extract_strided_slice %11 {offsets = [0, 16], sizes = [8, 8], strides = [1, 1]} : vector<8x32xf32> to vector<8x8xf32>
    %c0_32 = arith.constant 0 : index
    %c2 = arith.constant 2 : index
    %c0_33 = arith.constant 0 : index
    %c0_34 = arith.constant 0 : index
    %45 = vector.load %arg4[%c0_32, %c2, %c0_33, %c0_34] : memref<1x4x8x8xf32, #tpu.memory_space<vmem>>, vector<1x1x8x8xf32>
    %46 = vector.shape_cast %45 : vector<1x1x8x8xf32> to vector<8x8xf32>
    %c0_35 = arith.constant 0 : index
    %c2_36 = arith.constant 2 : index
    %c0_37 = arith.constant 0 : index
    %c0_38 = arith.constant 0 : index
    %47 = vector.load %arg5[%c0_35, %c2_36, %c0_37, %c0_38] : memref<1x4x8x8xf32, #tpu.memory_space<vmem>>, vector<1x1x8x8xf32>
    %48 = vector.shape_cast %47 : vector<1x1x8x8xf32> to vector<8x8xf32>
    %cst_39 = arith.constant dense<0.000000e+00> : vector<8x8xf32>
    %49 = tpu.matmul %44, %46, %cst_39 {dimension_numbers = #tpu.dot_dimension_numbers<[1], [1], [0], [0], [0, 0, 1, 0], [], []>} : vector<8x8xf32>, vector<8x8xf32>, vector<8x8xf32> -> vector<8x8xf32>
    %cst_40 = arith.constant dense<0xFF800000> : vector<8xf32>
    %50 = vector.multi_reduction <maximumf>, %49, %cst_40 [1] : vector<8x8xf32> to vector<8xf32>
    %51 = vector.shape_cast %50 : vector<8xf32> to vector<8x1xf32>
    %52 = vector.broadcast %51 : vector<8x1xf32> to vector<8x8xf32>
    %53 = arith.subf %49, %52 : vector<8x8xf32>
    %54 = math.exp %53 : vector<8x8xf32>
    %cst_41 = arith.constant dense<0.000000e+00> : vector<8xf32>
    %55 = vector.multi_reduction <add>, %54, %cst_41 [1] : vector<8x8xf32> to vector<8xf32>
    %56 = vector.shape_cast %55 : vector<8xf32> to vector<8x1xf32>
    %cst_42 = arith.constant dense<0.000000e+00> : vector<8x8xf32>
    %57 = tpu.matmul %54, %48, %cst_42 {dimension_numbers = #tpu.dot_dimension_numbers<[1], [0], [0], [1], [0, 0, 1, 1], [], []>} : vector<8x8xf32>, vector<8x8xf32>, vector<8x8xf32> -> vector<8x8xf32>
    %58 = vector.broadcast %56 : vector<8x1xf32> to vector<8x8xf32>
    %59 = arith.divf %57, %58 : vector<8x8xf32>
    %60 = vector.extract_strided_slice %11 {offsets = [0, 24], sizes = [8, 8], strides = [1, 1]} : vector<8x32xf32> to vector<8x8xf32>
    %c0_43 = arith.constant 0 : index
    %c3 = arith.constant 3 : index
    %c0_44 = arith.constant 0 : index
    %c0_45 = arith.constant 0 : index
    %61 = vector.load %arg4[%c0_43, %c3, %c0_44, %c0_45] : memref<1x4x8x8xf32, #tpu.memory_space<vmem>>, vector<1x1x8x8xf32>
    %62 = vector.shape_cast %61 : vector<1x1x8x8xf32> to vector<8x8xf32>
    %c0_46 = arith.constant 0 : index
    %c3_47 = arith.constant 3 : index
    %c0_48 = arith.constant 0 : index
    %c0_49 = arith.constant 0 : index
    %63 = vector.load %arg5[%c0_46, %c3_47, %c0_48, %c0_49] : memref<1x4x8x8xf32, #tpu.memory_space<vmem>>, vector<1x1x8x8xf32>
    %64 = vector.shape_cast %63 : vector<1x1x8x8xf32> to vector<8x8xf32>
    %cst_50 = arith.constant dense<0.000000e+00> : vector<8x8xf32>
    %65 = tpu.matmul %60, %62, %cst_50 {dimension_numbers = #tpu.dot_dimension_numbers<[1], [1], [0], [0], [0, 0, 1, 0], [], []>} : vector<8x8xf32>, vector<8x8xf32>, vector<8x8xf32> -> vector<8x8xf32>
    %cst_51 = arith.constant dense<0xFF800000> : vector<8xf32>
    %66 = vector.multi_reduction <maximumf>, %65, %cst_51 [1] : vector<8x8xf32> to vector<8xf32>
    %67 = vector.shape_cast %66 : vector<8xf32> to vector<8x1xf32>
    %68 = vector.broadcast %67 : vector<8x1xf32> to vector<8x8xf32>
    %69 = arith.subf %65, %68 : vector<8x8xf32>
    %70 = math.exp %69 : vector<8x8xf32>
    %cst_52 = arith.constant dense<0.000000e+00> : vector<8xf32>
    %71 = vector.multi_reduction <add>, %70, %cst_52 [1] : vector<8x8xf32> to vector<8xf32>
    %72 = vector.shape_cast %71 : vector<8xf32> to vector<8x1xf32>
    %cst_53 = arith.constant dense<0.000000e+00> : vector<8x8xf32>
    %73 = tpu.matmul %70, %64, %cst_53 {dimension_numbers = #tpu.dot_dimension_numbers<[1], [0], [0], [1], [0, 0, 1, 1], [], []>} : vector<8x8xf32>, vector<8x8xf32>, vector<8x8xf32> -> vector<8x8xf32>
    %74 = vector.broadcast %72 : vector<8x1xf32> to vector<8x8xf32>
    %75 = arith.divf %73, %74 : vector<8x8xf32>
    %76 = tpu.concatenate %27, %43, %59, %75 in 1 : vector<8x8xf32>, vector<8x8xf32>, vector<8x8xf32>, vector<8x8xf32> -> vector<8x32xf32>
    %c0_54 = arith.constant 0 : index
    %c0_55 = arith.constant 0 : index
    %77 = vector.load %arg11[%c0_54, %c0_55] : memref<8x32xf32, #tpu.memory_space<vmem>>, vector<8x32xf32>
    %c0_56 = arith.constant 0 : index
    %c0_57 = arith.constant 0 : index
    %c0_58 = arith.constant 0 : index
    %78 = vector.load %arg8[%c0_56, %c0_57, %c0_58] : memref<1x32x32xf32, #tpu.memory_space<vmem>>, vector<1x32x32xf32>
    %79 = vector.shape_cast %78 : vector<1x32x32xf32> to vector<32x32xf32>
    %cst_59 = arith.constant dense<0.000000e+00> : vector<8x32xf32>
    %80 = tpu.matmul %76, %79, %cst_59 {dimension_numbers = #tpu.dot_dimension_numbers<[1], [0], [0], [1], [0, 0, 1, 1], [], []>} : vector<8x32xf32>, vector<32x32xf32>, vector<8x32xf32> -> vector<8x32xf32>
    %81 = arith.addf %77, %80 : vector<8x32xf32>
    %c0_60 = arith.constant 0 : index
    %c0_61 = arith.constant 0 : index
    %82 = vector.load %arg11[%c0_60, %c0_61] : memref<8x32xf32, #tpu.memory_space<vmem>>, vector<8x32xf32>
    tpu.vector_store %arg11[%c0_60, %c0_61], %81 {strides = array<i32>} : memref<8x32xf32, #tpu.memory_space<vmem>>, vector<8x32xf32>,
    %c0_i32_62 = arith.constant 0 : i32
    %83 = arith.cmpi eq, %arg2, %c0_i32_62 : i32
    %84 = arith.extui %83 : i1 to i32
    %c0_i32_63 = arith.constant 0 : i32
    %85 = arith.cmpi ne, %84, %c0_i32_63 : i32
    scf.if %85 {
      %c0_64 = arith.constant 0 : index
      %c0_65 = arith.constant 0 : index
      %86 = vector.load %arg9[%c0_64, %c0_65] : memref<3x32xf32, #tpu.memory_space<vmem>>, vector<3x32xf32>
      %c0_66 = arith.constant 0 : index
      %c0_67 = arith.constant 0 : index
      %c0_68 = arith.constant 0 : index
      %87 = vector.load %arg3[%c0_66, %c0_67, %c0_68] : memref<1x8x32xf32, #tpu.memory_space<vmem>>, vector<1x8x32xf32>
      %88 = vector.shape_cast %87 : vector<1x8x32xf32> to vector<8x32xf32>
      %c0_69 = arith.constant 0 : index
      %c0_70 = arith.constant 0 : index
      %89 = vector.load %arg11[%c0_69, %c0_70] : memref<8x32xf32, #tpu.memory_space<vmem>>, vector<8x32xf32>
      %90 = arith.addf %88, %89 : vector<8x32xf32>
      %91 = vector.extract_strided_slice %86 {offsets = [0, 0], sizes = [1, 32], strides = [1, 1]} : vector<3x32xf32> to vector<1x32xf32>
      %92 = vector.broadcast %91 : vector<1x32xf32> to vector<8x32xf32>
      %93 = arith.addf %90, %92 : vector<8x32xf32>
      %cst_71 = arith.constant dense<0.000000e+00> : vector<8xf32>
      %94 = vector.multi_reduction <add>, %93, %cst_71 [1] : vector<8x32xf32> to vector<8xf32>
      %95 = vector.shape_cast %94 : vector<8xf32> to vector<8x1xf32>
      %cst_72 = arith.constant 3.200000e+01 : f32
      %96 = vector.broadcast %cst_72 : f32 to vector<8x1xf32>
      %97 = arith.divf %95, %96 : vector<8x1xf32>
      %98 = vector.broadcast %97 : vector<8x1xf32> to vector<8x32xf32>
      %99 = arith.subf %93, %98 : vector<8x32xf32>
      %100 = arith.mulf %99, %99 : vector<8x32xf32>
      %cst_73 = arith.constant dense<0.000000e+00> : vector<8xf32>
      %101 = vector.multi_reduction <add>, %100, %cst_73 [1] : vector<8x32xf32> to vector<8xf32>
      %102 = vector.shape_cast %101 : vector<8xf32> to vector<8x1xf32>
      %cst_74 = arith.constant 3.200000e+01 : f32
      %103 = vector.broadcast %cst_74 : f32 to vector<8x1xf32>
      %104 = arith.divf %102, %103 : vector<8x1xf32>
      %cst_75 = arith.constant 9.99999974E-6 : f32
      %105 = vector.broadcast %cst_75 : f32 to vector<8x1xf32>
      %106 = arith.addf %104, %105 : vector<8x1xf32>
      %107 = math.rsqrt %106 : vector<8x1xf32>
      %108 = vector.broadcast %107 : vector<8x1xf32> to vector<8x32xf32>
      %109 = arith.mulf %99, %108 : vector<8x32xf32>
      %110 = vector.extract_strided_slice %86 {offsets = [1, 0], sizes = [1, 32], strides = [1, 1]} : vector<3x32xf32> to vector<1x32xf32>
      %111 = vector.broadcast %110 : vector<1x32xf32> to vector<8x32xf32>
      %112 = arith.mulf %109, %111 : vector<8x32xf32>
      %113 = vector.extract_strided_slice %86 {offsets = [2, 0], sizes = [1, 32], strides = [1, 1]} : vector<3x32xf32> to vector<1x32xf32>
      %114 = vector.broadcast %113 : vector<1x32xf32> to vector<8x32xf32>
      %115 = arith.addf %112, %114 : vector<8x32xf32>
      %c0_76 = arith.constant 0 : index
      %c0_77 = arith.constant 0 : index
      %c0_78 = arith.constant 0 : index
      %116 = vector.load %arg10[%c0_76, %c0_77, %c0_78] : memref<1x8x32xf32, #tpu.memory_space<vmem>>, vector<1x8x32xf32>
      %117 = vector.shape_cast %116 : vector<1x8x32xf32> to vector<8x32xf32>
      %118 = vector.shape_cast %115 : vector<8x32xf32> to vector<1x8x32xf32>
      tpu.vector_store %arg10[%c0_76, %c0_77, %c0_78], %118 {strides = array<i32>} : memref<1x8x32xf32, #tpu.memory_space<vmem>>, vector<1x8x32xf32>,
    } else {
    }
    return
  }
  func.func @transform_0(%arg0: i32, %arg1: i32, %arg2: i32) -> (i32, i32, i32) {
    %c0_i32 = arith.constant 0 : i32
    %c0_i32_0 = arith.constant 0 : i32
    return %arg0, %arg1, %c0_i32 : i32, i32, i32
  }
  func.func @transform_1(%arg0: i32, %arg1: i32, %arg2: i32) -> (i32, i32, i32, i32) {
    %c0_i32 = arith.constant 0 : i32
    %c0_i32_0 = arith.constant 0 : i32
    %c0_i32_1 = arith.constant 0 : i32
    return %arg0, %arg2, %c0_i32, %c0_i32_0 : i32, i32, i32, i32
  }
  func.func @transform_2(%arg0: i32, %arg1: i32, %arg2: i32) -> (i32, i32, i32, i32) {
    %c0_i32 = arith.constant 0 : i32
    %c0_i32_0 = arith.constant 0 : i32
    %c0_i32_1 = arith.constant 0 : i32
    return %arg0, %arg2, %c0_i32, %c0_i32_0 : i32, i32, i32, i32
  }
  func.func @transform_3(%arg0: i32, %arg1: i32, %arg2: i32) -> (i32, i32, i32) {
    %c0_i32 = arith.constant 0 : i32
    %c0_i32_0 = arith.constant 0 : i32
    %c0_i32_1 = arith.constant 0 : i32
    return %arg2, %c0_i32, %c0_i32_0 : i32, i32, i32
  }
  func.func @transform_4(%arg0: i32, %arg1: i32, %arg2: i32) -> (i32, i32, i32) {
    %c0_i32 = arith.constant 0 : i32
    %c0_i32_0 = arith.constant 0 : i32
    %c0_i32_1 = arith.constant 0 : i32
    return %arg2, %c0_i32, %c0_i32_0 : i32, i32, i32
  }
  func.func @transform_5(%arg0: i32, %arg1: i32, %arg2: i32) -> (i32, i32, i32) {
    %c0_i32 = arith.constant 0 : i32
    %c0_i32_0 = arith.constant 0 : i32
    %c0_i32_1 = arith.constant 0 : i32
    return %arg2, %c0_i32, %c0_i32_0 : i32, i32, i32
  }
  func.func @transform_6(%arg0: i32, %arg1: i32, %arg2: i32) -> (i32, i32) {
    %c0_i32 = arith.constant 0 : i32
    %c0_i32_0 = arith.constant 0 : i32
    %c0_i32_1 = arith.constant 0 : i32
    return %c0_i32, %c0_i32_0 : i32, i32
  }
  func.func @transform_7(%arg0: i32, %arg1: i32, %arg2: i32) -> (i32, i32, i32) {
    %c0_i32 = arith.constant 0 : i32
    %c0_i32_0 = arith.constant 0 : i32
    return %arg0, %arg1, %c0_i32 : i32, i32, i32
  }
}

</mosaic_0001>

<bundles_post_ra>
// kernel: tpu_custom_call.1
= control target key start
LH: loop header
LB: loop body
LE: loop exit
PB: predicated region body
PF: predicated region fallthrough
CT: control target
= control target key end

     0   :  { %s2526_s0 = inlined_call_operand.hbm [shape: f32[2,8,32], index: 0, kind: input, shape index: {}]   ;;  %s2527_s1 = inlined_call_operand.hbm [shape: f32[2,4,8,8], index: 1, kind: input, shape index: {}]   ;;  %s2528_s2 = inlined_call_operand.hbm [shape: f32[2,4,8,8], index: 2, kind: input, shape index: {}]   ;;  %s2529_s3 = inlined_call_operand.hbm [shape: f32[1,32,32], index: 3, kind: input, shape index: {}]   ;;  %s2530_s4 = inlined_call_operand.vmem [shape: f32[1,1,32], index: 4, kind: input, shape index: {}]   ;;  %s2531_s5 = inlined_call_operand.hbm [shape: f32[1,32,32], index: 5, kind: input, shape index: {}]   ;;  %s2532_s6 = inlined_call_operand.vmem [shape: f32[3,32], index: 6, kind: input, shape index: {}]   ;;  %s2533_s7 = inlined_call_operand.hbm [shape: f32[2,8,32], index: 7, kind: output, shape index: {}]  }
   0x1   :  { %2558 = sst [smem:[#allocation25_spill]] %s2527_s1 }
   0x2   :  { %2559 = sst [smem:[#allocation26_spill]] %s2529_s3 }
   0x3   :  { %2560 = sst [smem:[#allocation27_spill]] %s2530_s4 }
   0x4   :  { %2561 = sst [smem:[#allocation28_spill]] %s2532_s6 }
   0x5   :  { %2562 = sst [smem:[#allocation29_spill]] %s2533_s7 }
   0x6   :  { %12 = vsyncpa [#allocation4], 0 }
   0x7   :  { %14 = vsyncpa [#allocation4 + $0x1], 0 }
   0x8   :  { %15 = vsyncpa [#allocation7], 0 }
   0x9   :  { %17 = vsyncpa [#allocation7 + $0x1], 0 }
   0xa   :  { %18 = vsyncpa [#allocation10], 0 }
   0xb   :  { %19 = vsyncpa [#allocation5], 0 }
   0xc   :  { %21 = vsyncpa [#allocation5 + $0x1], 0  ;;  %s2096_s24 = smov 0   ;;  %s2098_s25 = smov 0  }
   0xd   :  { %s2100_s26 = smov 0   ;;  %s2102_s27 = smov 0  }
   0xe   :  { %s2104_s28 = smov 0   ;;  %s2106_s29 = smov 0  }
   0xf LB: > { %2563 = sst [smem:[#allocation17_spill]] %s2017_s24  ;;  %s2127_s30 = sadd.s32 4294967295, %s2037_s29   ;;  %s2037_s29 = sphi %s2106_s29, %s27_s29   ;;  %s2033_s28 = sphi %s2104_s28, %s2613_s28   ;;  %s2029_s27 = sphi %s2102_s27, %s2612_s27   ;;  %s2025_s26 = sphi %s2100_s26, %s2608_s26   ;;  %s2021_s25 = sphi %s2098_s25, %s2611_s25   ;;  %s2017_s24 = sphi %s2096_s24, %s2610_s24  }
  0x10   : > { %2564 = sst [smem:[#allocation18_spill]] %s2025_s26  ;;  %s1531_s8 = sadd.s32 4294967294, %s2037_s29  }
  0x11   : > { %2565 = sst [smem:[#allocation19_spill]] %s2029_s27  ;;  %p62_p0 = scmp.ne.s32.totalorder %s2025_s26, %s2021_s25 }
  0x12   : > { %2566 = sst [smem:[#allocation20_spill]] %s2037_s29  ;;  %p63_p1 = scmp.eq.s32.totalorder %s2037_s29, 0 }
  0x13   : > { %p68_p2 = scmp.ne.s32.totalorder %s2021_s25, %s2017_s24  ;;  %p2535_p3 = scmp.eq.s32.totalorder %s2127_s30, 0 }
  0x14   : > { %p249_p4 = scmp.eq.s32.totalorder %s2127_s30, 1  ;;  %p2138_p5 = por %p63_p1, %p62_p0 }
  0x15   : > { %p255_p6 = scmp.eq.s32.totalorder %s1531_s8, 1  ;;  %p2144_p7 = por %p2535_p3, %p68_p2 }
  0x16   : > { %p2148_p8 = por %p249_p4, %p62_p0  ;;  %p1532_p10 = scmp.ge.s32.totalorder %s2037_s29, 1 }
  0x17   : > { %s2568_s11 = scalar_select %p2144_p7, 1, 0 }
  0x18   : > { %s2569_s12 = scalar_select %p2148_p8, 1, 0 }
  0x19   : > { %p2152_p9 = por %p255_p6, %p68_p2  ;;  %p262_p11 = scmp.lt.s32.totalorder %s2037_s29, 3 }
  0x1a   : > { %2570 = sst [smem:[#allocation21_spill]] %s2569_s12  ;;  %s2039_s15 = smov [#allocation9]  }
  0x1b   : > { %s2571_s13 = scalar_select %p2152_p9, 1, 0 }
  0x1c   : > { %p2158_p12 = pnand %p1532_p10, %p262_p11  ;;  %s277_s16 = sshll.u32 %s2039_s15, 4  ;;  %s2162_s16 = int_to_ptr.vmem [resolvable:$true] %s277_s16 }
  0x1d   : > { %2572 = sst [smem:[#allocation22_spill]] %s2571_s13  ;;  %s46_s18 = sadd.s32 1, %s2033_s28 }
  0x1e   : > { %s2573_s14 = scalar_select %p2158_p12, 1, 0 }
  0x1f   : > { %p1695_p13 = pneg %p2158_p12  ;;  %s2176_s19 = sand.u32 1, %s2025_s26  }
  0x20   : > { %p2178_p4 = scmp.ge.s32.totalorder %s46_s18, 2  ;;  %s2576_s3 = sld [smem:[#allocation26_spill]] }
  0x21   : > { %p2170_p2 = pnand %p1695_p13, %p2535_p3 }
  0x23   : > { %s2574_s17 = scalar_select %p2170_p2, 1, 0 }
  0x24   : > { %p2547_p10 = pneg %p2170_p2 }
  0x26   : > { %s1801_s23 = scalar_lea.hbm %s2576_s3, 512 }
  0x27   : > { %p1802_p6 = scmp.ne.s32.totalorder %s2576_s3, %s1801_s23  ;;  %p1808_p0 = scmp.lt.u32.totalorder %s1801_s23, %s2576_s3 }
  0x29   : > { %p1804_p11 = pnand %p2547_p10, %p1802_p6 }
  0x2b   : > { %p1805_p13 = pneg %p1804_p11 }
  0x2d   : > { %p1810_p3 = pnand %p1808_p0, %p1805_p13 }
  0x2f   : > { %1813 = shalt.err (!%p1810_p3)
}
  0x30   : > { %s1814_s21 = scalar_lea.vmem %s2162_s16, 512  ;;  %p1822_p7 = scmp.lt.s32.totalorder %s2162_s16, %s2162_s16 }
  0x31   : > { %p1815_p1 = scmp.ne.s32.totalorder %s2162_s16, %s1814_s21  ;;  %p1823_p6 = scmp.lt.s32.totalorder %s1814_s21, %s1814_s21 }
  0x33   : > { %p1817_p9 = pnand %p1815_p1, %p2547_p10  ;;  %p1824_p11 = por %p1823_p6, %p1822_p7 }
  0x35   : > { %p1818_p8 = pneg %p1817_p9 }
  0x37   : > { %p1825_p12 = pnand %p1824_p11, %p1818_p8 }
  0x39   : > { %1828 = shalt.err (!%p1825_p12)
}
  0x3a   : > { %s2543_s9 = smov 128   ;;  %s2041_s13 = smov 8  }
  0x3b   : > { %1698 = dma.hbm_to_vmem [thread:$0]  (!%p2170_p2), %s2576_s3, 512, %s2162_s16, [#allocation10], %s2543_s9, %s2543_s9, %s2041_s13  }
  0x3c   : > { %s2615_s18 = smov (%p2178_p4, %s46_s18), 0  ;;  %p2578_p3 = scmp.lt.s32.totalorder %s2037_s29, 2 }
  0x3d   : > { %2577 = sst [smem:[#allocation23_spill]] %s2615_s18  ;;  %s335_s15 = sand.u32 1, %s2037_s29  }
  0x3e   : > { %p2220_p7 = pnand %p2578_p3, %p2138_p5  ;;  %s50_s21 = ssub.s32 %s2033_s28, %s2615_s18 }
  0x3f   : > { %p53_p8 = scmp.eq.s32.totalorder %s50_s21, 0  ;;  %s2545_s24 = sshll.u32 %s2176_s19, 5 }
  0x40   : > { %s2579_s8 = scalar_select %p2220_p7, 1, 0 }
  0x41   : > { %s2546_s7 = sshll.u32 %s2033_s28, 9  ;;  %s2580_s12 = sadd.s32 1, %s2025_s26 }
  0x42   : > { %s2232_s27 = scalar_select %p53_p8, %s2025_s26, %s2580_s12  }
  0x43   : > { %s2582_s1 = sld [smem:[#allocation25_spill]]  ;;  %s339_s22 = scalar_lea.vmem [#allocation6], %s2545_s24 }
  0x44   : > { %2581 = sst [smem:[#allocation24_spill]] %s2232_s27  ;;  %s348_s23 = sshll.u32 %s339_s22, 4  ;;  %s2243_s23 = int_to_ptr.vmem [resolvable:$true] %s348_s23 }
  0x45   : > { %s2245_s21 = scalar_lea.sflag [#allocation7], %s335_s15  ;;  %p2251_p9 = pneg %p2220_p7 }
  0x47   : > { %s2583_s12 = scalar_select %p2251_p9, 1, 0 }
  0x49   : > { %s2239_s10 = scalar_lea.hbm %s2582_s1, %s2546_s7  ;;  %s1834_s24 = scalar_lea.hbm %s2582_s1, 1024 }
  0x4a   : > { %s1829_s9 = scalar_lea.hbm %s2239_s10, 512  ;;  %p1835_p1 = scmp.lt.u32.totalorder %s2239_s10, %s2582_s1 }
  0x4b   : > { %p1830_p5 = scmp.ne.s32.totalorder %s2239_s10, %s1829_s9  ;;  %p1836_p4 = scmp.lt.u32.totalorder %s1834_s24, %s1829_s9 }
  0x4c   : > { %p1838_p6 = scmp.lt.u32.totalorder %s1829_s9, %s2239_s10 }
  0x4d   : > { %p1832_p12 = pnand %p2251_p9, %p1830_p5  ;;  %p1837_p13 = por %p1836_p4, %p1835_p1 }
  0x4f   : > { %p1833_p0 = pneg %p1832_p12  ;;  %p1839_p11 = por %p1838_p6, %p1837_p13 }
  0x51   : > { %p1840_p3 = pnand %p1839_p11, %p1833_p0 }
  0x53   : > { %1843 = shalt.err (!%p1840_p3)
}
  0x54   : > { %s1844_s15 = scalar_lea.vmem %s2243_s23, 512  ;;  %s2042_s16 = smov [#allocation6]  }
  0x55   : > { %p1845_p8 = scmp.ne.s32.totalorder %s2243_s23, %s1844_s15  ;;  %s1849_s20 = sshll.u32 %s2042_s16, 4  ;;  %s1850_s20 = int_to_ptr.vmem [resolvable:$false] %s1849_s20 }
  0x56   : > { %s1851_s7 = scalar_lea.vmem %s1850_s20, 1024  ;;  %p1852_p10 = scmp.lt.s32.totalorder %s2243_s23, %s1850_s20 }
  0x57   : > { %p1847_p5 = pnand %p1845_p8, %p2251_p9  ;;  %p1853_p2 = scmp.lt.s32.totalorder %s1851_s7, %s1844_s15 }
  0x59   : > { %p1848_p12 = pneg %p1847_p5  ;;  %p1854_p1 = por %p1853_p2, %p1852_p10 }
  0x5b   : > { %p1855_p4 = pnand %p1854_p1, %p1848_p12 }
  0x5d   : > { %1858 = shalt.err (!%p1855_p4)
}
  0x5e   : > { %s2584_s24 = smov 128   ;;  %s2585_s9 = sshll.u32 %s2033_s28, 9 }
  0x5f   : > { %1708 = dma.hbm_to_vmem [thread:$0]  (!%p2220_p7), %s2239_s10, 512, %s2243_s23, %s2245_s21, %s2584_s24, %s2584_s24, %s2041_s13  }
  0x60   : > { %s2283_s15 = scalar_lea.hbm %s2528_s2, %s2585_s9  ;;  %s2586_s20 = sshll.u32 %s2176_s19, 5 }
  0x61   : > { %s362_s7 = scalar_lea.vmem [#allocation8], %s2586_s20  ;;  %s2043_s3 = smov [#allocation11]  }
  0x62   : > { %s371_s1 = sshll.u32 %s362_s7, 4  ;;  %s299_s18 = sshll.u32 %s2043_s3, 4  ;;  %s300_s18 = int_to_ptr.vmem [resolvable:$true] %s299_s18  ;;  %s2317_s1 = int_to_ptr.vmem [resolvable:$true] %s371_s1 }
  0x63   : > { %s1859_s29 = scalar_lea.hbm %s2531_s5, 512  ;;  %p2587_p10 = scmp.ne.s32.totalorder %s2574_s17, 0 }
  0x64   : > { %p1860_p2 = scmp.ne.s32.totalorder %s2531_s5, %s1859_s29  ;;  %p1866_p11 = scmp.lt.u32.totalorder %s1859_s29, %s2531_s5 }
  0x65   : > { %p2588_p0 = pneg %p2587_p10 }
  0x67   : > { %p1862_p13 = pnand %p1860_p2, %p2588_p0 }
  0x69   : > { %p1863_p6 = pneg %p1862_p13 }
  0x6b   : > { %p1868_p3 = pnand %p1866_p11, %p1863_p6 }
  0x6d   : > { %1871 = shalt.err (!%p1868_p3)
}
  0x6e   : > { %s1872_s3 = scalar_lea.vmem %s300_s18, 512  ;;  %p2589_p5 = pmov %p2588_p0 }
  0x6f   : > { %p1873_p8 = scmp.ne.s32.totalorder %s300_s18, %s1872_s3  ;;  %p1880_p4 = scmp.lt.s32.totalorder %s300_s18, %s300_s18 }
  0x70   : > { %p1881_p7 = scmp.lt.s32.totalorder %s1872_s3, %s1872_s3 }
  0x71   : > { %p1875_p12 = pnand %p1873_p8, %p2589_p5 }
  0x72   : > { %p1882_p9 = por %p1881_p7, %p1880_p4 }
  0x73   : > { %p1876_p1 = pneg %p1875_p12 }
  0x75   : > { %p1883_p0 = pnand %p1882_p9, %p1876_p1 }
  0x77   : > { %1886 = shalt.err (!%p1883_p0)
}
  0x78   : > { %1701 = dma.hbm_to_vmem [thread:$0]  (!%p2587_p10), %s2531_s5, 512, %s300_s18, [#allocation10], %s2584_s24, %s2584_s24, %s2041_s13  }
  0x79   : > { %s1537_s26 = sshll.u32 %s2176_s19, 3  ;;  %s1538_s27 = sshll.u32 %s2033_s28, 7 }
  0x7a   : > { %s2315_s22 = scalar_lea.hbm %s2526_s0, %s1538_s27  ;;  %s320_s17 = scalar_lea.vmem [#allocation3], %s1537_s26 }
  0x7b   : > { %s328_s16 = sshll.u32 %s320_s17, 4  ;;  %s317_s20 = scalar_lea.sflag [#allocation4], %s2176_s19  ;;  %s329_s16 = int_to_ptr.vmem [resolvable:$true] %s328_s16 }
  0x7c   : > { %s1887_s7 = scalar_lea.hbm %s2315_s22, 128  ;;  %p2590_p9 = scmp.ne.s32.totalorder %s2583_s12, 0 }
  0x7d   : > { %p1888_p7 = scmp.ne.s32.totalorder %s2315_s22, %s1887_s7  ;;  %s1892_s23 = scalar_lea.hbm %s2526_s0, 256 }
  0x7e   : > { %p1893_p13 = scmp.lt.u32.totalorder %s2315_s22, %s2526_s0  ;;  %p1894_p6 = scmp.lt.u32.totalorder %s1892_s23, %s1887_s7 }
  0x7f   : > { %p1890_p2 = pnand %p1888_p7, %p2590_p9  ;;  %p1896_p3 = scmp.lt.u32.totalorder %s1887_s7, %s2315_s22 }
  0x80   : > { %p1895_p11 = por %p1894_p6, %p1893_p13 }
  0x81   : > { %p1891_p10 = pneg %p1890_p2 }
  0x82   : > { %p1897_p8 = por %p1896_p3, %p1895_p11 }
  0x84   : > { %p1898_p5 = pnand %p1897_p8, %p1891_p10 }
  0x86   : > { %1901 = shalt.err (!%p1898_p5)
}
  0x87   : > { %s1902_s19 = scalar_lea.vmem %s329_s16, 128  ;;  %s2044_s6 = smov [#allocation3]  }
  0x88   : > { %p1903_p12 = scmp.ne.s32.totalorder %s329_s16, %s1902_s19  ;;  %s1907_s26 = sshll.u32 %s2044_s6, 4  ;;  %s1908_s26 = int_to_ptr.vmem [resolvable:$false] %s1907_s26 }
  0x89   : > { %s1909_s27 = scalar_lea.vmem %s1908_s26, 256  ;;  %p1910_p0 = scmp.lt.s32.totalorder %s329_s16, %s1908_s26 }
  0x8a   : > { %p1905_p1 = pnand %p1903_p12, %p2590_p9  ;;  %p1911_p7 = scmp.lt.s32.totalorder %s1909_s27, %s1902_s19 }
  0x8c   : > { %p1906_p4 = pneg %p1905_p1  ;;  %p1912_p2 = por %p1911_p7, %p1910_p0 }
  0x8e   : > { %p1913_p6 = pnand %p1912_p2, %p1906_p4 }
  0x90   : > { %1916 = shalt.err (!%p1913_p6)
}
  0x91   : > { %p2591_p13 = scmp.ne.s32.totalorder %s2579_s8, 0  ;;  %s1917_s29 = scalar_lea.hbm %s2283_s15, 512 }
  0x92   : > { %p1918_p10 = scmp.ne.s32.totalorder %s2283_s15, %s1917_s29  ;;  %s1922_s7 = scalar_lea.hbm %s2528_s2, 1024 }
  0x93   : > { %1705 = dma.hbm_to_vmem [thread:$0]  (!%p2591_p13), %s2315_s22, 128, %s329_s16, %s317_s20  }
  0x94   : > { %p1920_p11 = pnand %p1918_p10, %p2590_p9  ;;  %p1923_p8 = scmp.lt.u32.totalorder %s2283_s15, %s2528_s2 }
  0x95   : > { %p1924_p5 = scmp.lt.u32.totalorder %s1922_s7, %s1917_s29  ;;  %p1926_p1 = scmp.lt.u32.totalorder %s1917_s29, %s2283_s15 }
  0x96   : > { %p1921_p3 = pneg %p1920_p11 }
  0x97   : > { %p1925_p12 = por %p1924_p5, %p1923_p8 }
  0x99   : > { %p1927_p4 = por %p1926_p1, %p1925_p12 }
  0x9b   : > { %p1928_p0 = pnand %p1927_p4, %p1921_p3 }
  0x9d   : > { %1931 = shalt.err (!%p1928_p0)
}
  0x9e   : > { %s1932_s22 = scalar_lea.vmem %s2317_s1, 512  ;;  %s2045_s16 = smov [#allocation8]  }
  0x9f   : > { %p1933_p7 = scmp.ne.s32.totalorder %s2317_s1, %s1932_s22  ;;  %s1937_s20 = sshll.u32 %s2045_s16, 4  ;;  %s1938_s20 = int_to_ptr.vmem [resolvable:$false] %s1937_s20 }
  0xa0   : > { %s1939_s23 = scalar_lea.vmem %s1938_s20, 1024  ;;  %p1940_p10 = scmp.lt.s32.totalorder %s2317_s1, %s1938_s20 }
  0xa1   : > { %p1935_p2 = pnand %p1933_p7, %p2590_p9  ;;  %p1941_p11 = scmp.lt.s32.totalorder %s1939_s23, %s1932_s22 }
  0xa3   : > { %p1936_p6 = pneg %p1935_p2  ;;  %p1942_p8 = por %p1941_p11, %p1940_p10 }
  0xa5   : > { %p1943_p5 = pnand %p1942_p8, %p1936_p6 }
  0xa7   : > { %1946 = shalt.err (!%p1943_p5)
}
  0xa8   : > { %1711 = dma.hbm_to_vmem [thread:$0]  (!%p2591_p13), %s2283_s15, 512, %s2317_s1, %s2245_s21, %s2584_s24, %s2584_s24, %s2041_s13  }
  0xa9   : > { %p2592_p9 = scmp.ne.s32.totalorder %s2573_s14, 0 }
  0xaa   : > { %s2365_s12 = sand.u32 (!%p2592_p9), 1, %s2021_s25   ;;  %p2593_p3 = scmp.ne.s32.totalorder (!%p2592_p9), %s2568_s11, 0 }
  0xab   : > { %383 = sbr.rel (%p2592_p9) target bundleno = 2044 (0x7fc), region = 48  ;;  %s1546_s3 = sshll.u32 (!%p2592_p9), %s2365_s12, 3 }
  0xac   : > { %s386_s4 = scalar_lea.sflag (!%p2592_p9), [#allocation4], %s2365_s12  ;;  %s389_s8 = scalar_lea.vmem (!%p2592_p9), [#allocation3], %s1546_s3 }
  0xb2   : > { %2000 = dma.done.wait (%p2593_p3), %s386_s4, 128  }
  0xb3   : > { %2002 = vsyncadd (%p2593_p3), %s386_s4, 4294967168  ;;  %s394_s1 = sand.u32 1, %s2127_s30   ;;  %s1547_s14 = sshll.u32 %s2365_s12, 5 }
  0xb4   : > { %s395_s13 = scalar_lea.sflag [#allocation7], %s394_s1  ;;  %s2377_s21 = scalar_lea.vmem [#allocation6], %s1547_s14 }
  0xb5   : > { %2004 = dma.done.wait (%p2593_p3), %s395_s13, 1024  }
  0xb6   : > { %2006 = vsyncadd (%p2593_p3), %s395_s13, 4294966272  ;;  %s2383_s24 = scalar_lea.vmem [#allocation8], %s1547_s14  ;;  %p2594_p13 = scmp.eq.s32.totalorder %s2127_s30, 0 }
  0xb8   : > { %2008 = dma.done.wait (%p2594_p13), [#allocation10], 1024   ;;  %p2595_p12 = pmov %p2594_p13 }
  0xb9   : > { %vm468_vm0 = vcmask 261120   ;;  %v2046_v0 = vmov 0.0|0.0   ;;  %vm2047_vm1 = vmmov 0   ;;  %v2048_v1 = vmov 0.0   ;;  %v471_v2 = vld [vmem:[#allocation9] sm:$0xff]  ;;  %v472_v3 = vld [vmem:[#allocation9 + $0x8] sm:$0xff] }
  0xba   : > { %2010 = vsyncadd (%p2595_p12), [#allocation10], 4294966272  ;;  %1667 = vmatprep.subr.bf16.mxu0 %v2046_v0  ;;  %1613 = vmatprep.mubr.msk.f32.mxu0 %vm2047_vm1, %v2048_v1  ;;  %469 = vst.msk [vmem:[#allocation2] sm:$0xff] %vm468_vm0, %v2048_v1  ;;  %v473_v4 = vld [vmem:[#allocation9 + $0x10] sm:$0xff]  ;;  %v1668_v5 = vpack.c.bf16 %v472_v3, %v471_v2  ;;  %v474_v6 = vld [vmem:[#allocation9 + $0x18] sm:$0xff]  ;;  %vm558_vm2 = vcmask 64512  }
  0xbb   : > { %1616 = vmatprep.subr.mxu1 %v2048_v1  ;;  %1618 = vmatprep.mubr.msk.f32.mxu1 %vm2047_vm1, %v2048_v1  ;;  %v1671_v7 = vpack.c.bf16 %v474_v6, %v473_v4  ;;  %v2398_v8 = vld [vmem:[%s389_s8] sm:$0xff]  ;;  %v556_v9 = vld [vmem:[%s2377_s21] sm:$0xff]  ;;  %s2596_s15 = sld [smem:[#allocation27_spill]]  ;;  %s2049_s19 = smov 112   ;;  %v1557_v30 = vld [vmem:[%s2377_s21 + $0x8] sm:$0xff]  ;;  %vm1227_vm3 = vcmask 130048  }
  0xbc   : > { %1669 = vmatpush3.bf16.msra.mxu0 %v1668_v5  ;;  %1617 = vmatpush3.xpose.msk.msra.mxu1 %vm558_vm2, %v556_v9  ;;  %v1562_v10 = vld [vmem:[%s2377_s21 + $0x10] sm:$0xff]  ;;  %s2050_s6 = smov 104   ;;  %v1567_v15 = vld [vmem:[%s2377_s21 + $0x18] sm:$0xff]  ;;  %v557_v21 = vld [vmem:[%s2383_s24] sm:$0xff]  ;;  %s2051_s26 = smov 120   ;;  %vm1229_vm4 = vcmask 195584  }
  0xbd   : > { %1670 = vmatprep.subr.bf16.mxu0 %v2046_v0  ;;  %1621 = vmatprep.subr.mxu1 %v2048_v1  ;;  %v1558_v45 = vld [vmem:[%s2383_s24 + $0x8] sm:$0xff]  ;;  %v1563_v52 = vld [vmem:[%s2383_s24 + $0x10] sm:$0xff]  ;;  %v1568_v55 = vld [vmem:[%s2383_s24 + $0x18] sm:$0xff]  ;;  %s2052_s27 = smov 8   ;;  %s2053_s29 = smov 16  }
  0xbe   : > { %v1232_v60 = vld [vmem:[#allocation11] sm:$0xff]  ;;  %v1233_v61 = vld [vmem:[#allocation11 + $0x8] sm:$0xff]  ;;  %v1234_v63 = vld [vmem:[#allocation11 + $0x10] sm:$0xff]  ;;  %s2054_s9 = smov 24   ;;  %s2597_s18 = sld [smem:[#allocation28_spill]] }
  0xbf   : > { %v1674_v62 = vpack.c.bf16 %v1233_v61, %v1232_v60  ;;  %v1235_v2 = vld [vmem:[#allocation11 + $0x18] sm:$0xff]  ;;  %s2598_s10 = sld [smem:[#allocation19_spill]]  ;;  %s2599_s22 = sld [smem:[#allocation21_spill]] }
  0xc0   : > { %1672 = vmatpush3.bf16.msra.mxu0 %v1671_v7  ;;  %v1677_v4 = vpack.c.bf16 %v1235_v2, %v1234_v63  ;;  %s458_s20 = scalar_lea.vmem [#allocation12], %s1546_s3  ;;  %s2600_s1 = sld [smem:[#allocation29_spill]] }
  0xc1   : > { %1636 = vmatprep.subr.mxu0 %v2048_v1  ;;  %v1552_v11 = vld [vmem:[%s2596_s15] ss:$0 sm:$0xff]  ;;  %s1363_s23 = sshll.u32 %s458_s20, 4  ;;  %s1349_s13 = scalar_lea.sflag [#allocation5], %s2365_s12  ;;  %s2478_s23 = int_to_ptr.vmem [resolvable:$true] %s1363_s23 }
  0xc2   : > { %s1947_s21 = scalar_lea.vmem %s2478_s23, 128  ;;  %s2055_s3 = smov [#allocation12]  }
  0xc3   : > { %1614 = vmatmul.mubr.msk.f32.vlgmr.msra.gmra.mrb[0].mxu0 %vm468_vm0, %v2398_v8  ;;  %p1948_p1 = scmp.ne.s32.totalorder %s2478_s23, %s1947_s21  ;;  %s1951_s24 = sshll.u32 %s2055_s3, 4  ;;  %s1952_s24 = int_to_ptr.vmem [resolvable:$false] %s1951_s24 }
  0xc4   : > { %1638 = vmatprep.mubr.msk.f32.mxu0 %vm2047_vm1, %v2048_v1  ;;  %s1953_s30 = scalar_lea.vmem %s1952_s24, 256  ;;  %p1954_p2 = scmp.lt.s32.totalorder %s2478_s23, %s1952_s24 }
  0xc5   : > { %s1574_s16 = sshll.u32 %s2598_s10, 7  ;;  %p2601_p4 = scmp.ne.s32.totalorder %s2599_s22, 0 }
  0xc6   : > { %s2476_s14 = scalar_lea.hbm %s2600_s1, %s1574_s16  ;;  %p1955_p6 = scmp.lt.s32.totalorder %s1953_s30, %s1947_s21 }
  0xc7   : > { %p1949_p0 = pnand %p1948_p1, %p2601_p4 }
  0xc8   : > { %p1956_p10 = por %p1955_p6, %p1954_p2 }
  0xc9   : > { %1637 = vmatpush3.xpose.msk.msra.mxu0 %vm558_vm2, %v1562_v10  ;;  %p1950_p7 = pneg %p1949_p0 }
  0xca   : > { %1646 = vmatprep.subr.mxu0 %v2048_v1 }
  0xcb   : > { %p1957_p11 = pnand %p1956_p10, %p1950_p7 }
 0x196   : > { %v552_v12 = vpop.f32.mrb[0].mxu0 }
 0x197   : > { %v553_v13 = vadd.f32 %v1552_v11, %v552_v12  ;;  %v1615_v14 = vpop.f32.mrb[1].mxu0 }
 0x199   : > { %888 = vrot.lane.b32.xlu1 %v553_v13, %s2049_s19  ;;  %1619 = vmatmul.mubr.msk.f32.vlgmr.msra.gmra.mrb[0].mxu1 %vm558_vm2, %v553_v13 }
 0x19a   : > { %1623 = vmatprep.mubr.msk.f32.mxu1 %vm2047_vm1, %v2048_v1  ;;  %1622 = vmatpush3.msra.mxu1 %v557_v21 }
 0x19b   : > { %1626 = vmatprep.subr.mxu1 %v2048_v1 }
 0x19d   : > { %1053 = vrot.lane.b32.xlu1 %v553_v13, %s2050_s6 }
 0x20b   : > { %v889_v16 = vpop.permute.xlu1 %888 }
 0x20c   : > { %1639 = vmatmul.mubr.msk.f32.vlgmr.msra.gmra.mrb[2].mxu0 %vm558_vm2, %v889_v16 }
 0x20d   : > { %1647 = vmatpush3.xpose.msk.msra.mxu0 %vm558_vm2, %v1567_v15  ;;  %1648 = vmatprep.mubr.msk.f32.mxu0 %vm2047_vm1, %v2048_v1 }
 0x20e   : > { %1673 = vmatprep.subr.bf16.mxu0 %v2046_v0 }
 0x20f   : > { %v1054_v17 = vpop.permute.xlu1 %1053 }
 0x210   : > { %1649 = vmatmul.mubr.msk.f32.vlgmr.msra.gmra.mrb[4].mxu0 %vm558_vm2, %v1054_v17 }
 0x211   : > { %1664 = vmatprep.mubr.msk.f32.mxu0 %vm2047_vm1, %v2048_v1  ;;  %1675 = vmatpush3.bf16.msra.mxu0 %v1674_v62 }
 0x212   : > { %1676 = vmatprep.subr.bf16.mxu0 %v2046_v0 }
 0x215   : > { %1678 = vmatpush3.bf16.msra.mxu0 %v1677_v4 }
 0x26c   : > { %v631_v18 = vpop.f32.mrb[0].mxu1 }
 0x26d   : > { %v1620_v19 = vpop.f32.mrb[1].mxu1  ;;  %v635_v20 = vsel %vm558_vm2, %v631_v18, -inf }
 0x26e   : > { %636 = vmax.xlane.f32.xlu0 %v635_v20 }
 0x284   : > { %723 = vrot.lane.b32.xlu0 %v553_v13, %s2051_s26 }
 0x2df   : > { %v961_v22 = vpop.f32.mrb[2].mxu0 }
 0x2e0   : > { %v1640_v23 = vpop.f32.mrb[3].mxu0  ;;  %v965_v24 = vsel %vm558_vm2, %v961_v22, -inf }
 0x2e1   : > { %966 = vmax.xlane.f32.xlu0 %v965_v24 }
 0x2e3   : > { %v1126_v25 = vpop.f32.mrb[4].mxu0 }
 0x2e4   : > { %v1650_v26 = vpop.f32.mrb[5].mxu0  ;;  %v1130_v42 = vsel %vm558_vm2, %v1126_v25, -inf }
 0x2fb   : > { %v637_v27 = vpop.xlane.xlu0 %636 }
 0x2fc   : > { %v638_v28 = vsub.f32 %v631_v18, %v637_v27 }
 0x2fe   : > { %v639_v29 = vmul.f32 1.442695, %v638_v28 }
 0x2ff   : > { %v724_v33 = vpop.permute.xlu0 %723 }
 0x300   : > { %1783 = vpow2.f32 %v639_v29  ;;  %v1314_v29 = vld [vmem:[%s2597_s18] sm:$0x7] }
 0x30a   : > { %v1784_v31 = vpop.eup %1783 }
 0x30b   : > { %1624 = vmatmul.mubr.msk.f32.vlgmr.msra.gmra.mrb[2].mxu1 %vm558_vm2, %v1784_v31  ;;  %v641_v32 = vsel %vm558_vm2, %v1784_v31, 0.0 }
 0x30c   : > { %1627 = vmatpush3.xpose.msk.msra.mxu1 %vm558_vm2, %v1557_v30  ;;  %642 = vadd.xlane.f32.xlu0 %v641_v32  ;;  %v1231_v32 = vld [vmem:[#allocation2] sm:$0xff] }
 0x30d   : > { %1628 = vmatprep.mubr.msk.f32.mxu1 %vm2047_vm1, %v2048_v1  ;;  %1631 = vmatprep.subr.mxu1 %v2048_v1 }
 0x30f   : > { %1629 = vmatmul.mubr.msk.f32.vlgmr.msra.gmra.mrb[4].mxu1 %vm558_vm2, %v724_v33 }
 0x310   : > { %1633 = vmatprep.mubr.msk.f32.mxu1 %vm2047_vm1, %v2048_v1  ;;  %1632 = vmatpush3.msra.mxu1 %v1558_v45 }
 0x311   : > { %1641 = vmatprep.subr.mxu1 %v2048_v1 }
 0x36e   : > { %v967_v34 = vpop.xlane.xlu0 %966 }
 0x36f   : > { %v968_v35 = vsub.f32 %v961_v22, %v967_v34 }
 0x371   : > { %v969_v36 = vmul.f32 1.442695, %v968_v35 }
 0x373   : > { %1785 = vpow2.f32 %v969_v36 }
 0x37d   : > { %v1786_v43 = vpop.eup %1785 }
 0x37e   : > { %v971_v44 = vsel %vm558_vm2, %v1786_v43, 0.0 }
 0x399   : > { %v643_v16 = vpop.xlane.xlu0 %642 }
 0x3de   : > { %v2440_v37 = vpop.f32.mrb[2].mxu1 }
 0x3df   : > { %v1625_v38 = vpop.f32.mrb[3].mxu1 }
 0x3e2   : > { %v796_v39 = vpop.f32.mrb[4].mxu1 }
 0x3e3   : > { %v1630_v40 = vpop.f32.mrb[5].mxu1  ;;  %v800_v41 = vsel %vm558_vm2, %v796_v39, -inf }
 0x3e4   : > { %801 = vmax.xlane.f32.xlu1 %v800_v41 }
 0x3e8   : > { %1131 = vmax.xlane.f32.xlu1 %v1130_v42 }
 0x3ec   : > { %972 = vadd.xlane.f32.xlu1 %v971_v44 }
 0x471   : > { %v802_v46 = vpop.xlane.xlu1 %801 }
 0x472   : > { %v803_v47 = vsub.f32 %v796_v39, %v802_v46 }
 0x474   : > { %v804_v48 = vmul.f32 1.442695, %v803_v47 }
 0x475   : > { %v1132_v49 = vpop.xlane.xlu1 %1131 }
 0x476   : > { %1787 = vpow2.f32 %v804_v48  ;;  %v1133_v50 = vsub.f32 %v1126_v25, %v1132_v49  ;;  %v1318_v25 = vlaneseq }
 0x478   : > { %v1134_v51 = vmul.f32 1.442695, %v1133_v50  ;;  %v1319_v26 = vshrl.u32 %v1318_v25, 7 }
 0x479   : > { %v973_v58 = vpop.xlane.xlu1 %972 }
 0x47a   : > { %1789 = vpow2.f32 %v1134_v51  ;;  %v1339_v27 = vsub.s32 1, %v1319_v26  ;;  %v1344_v28 = vsub.s32 2, %v1319_v26  ;;  %v1320_v36 = vsub.s32 0, %v1319_v26 }
 0x47c   : > { %v1340_v30 = vrot.slane %v1314_v29, %v1339_v27  ;;  %v1345_v31 = vrot.slane %v1314_v29, %v1344_v28 }
 0x480   : > { %v1788_v53 = vpop.eup %1787 }
 0x481   : > { %1634 = vmatmul.mubr.msk.f32.vlgmr.msra.gmra.mrb[6].mxu1 %vm558_vm2, %v1788_v53  ;;  %v806_v54 = vsel %vm558_vm2, %v1788_v53, 0.0 }
 0x482   : > { %1642 = vmatpush3.msra.mxu1 %v1563_v52  ;;  %807 = vadd.xlane.f32.xlu1 %v806_v54 }
 0x483   : > { %1643 = vmatprep.mubr.msk.f32.mxu1 %vm2047_vm1, %v2048_v1  ;;  %1651 = vmatprep.subr.mxu1 %v2048_v1 }
 0x484   : > { %v1790_v56 = vpop.eup %1789 }
 0x485   : > { %1644 = vmatmul.mubr.msk.f32.vlgmr.msra.gmra.mrb[8].mxu1 %vm558_vm2, %v1786_v43  ;;  %v1136_v57 = vsel %vm558_vm2, %v1790_v56, 0.0 }
 0x486   : > { %1652 = vmatpush3.msra.mxu1 %v1568_v55  ;;  %1137 = vadd.xlane.f32.xlu1 %v1136_v57 }
 0x487   : > { %1653 = vmatprep.mubr.msk.f32.mxu1 %vm2047_vm1, %v2048_v1 }
 0x489   : > { %1654 = vmatmul.mubr.msk.f32.vlgmr.msra.gmra.mrb[10].mxu1 %vm558_vm2, %v1790_v56 }
 0x50f   : > { %v808_v59 = vpop.xlane.xlu1 %807 }
 0x510   : > { %1791 = vrcp.f32 %v808_v59 }
 0x511   : > { %1793 = vrcp.f32 %v973_v58 }
 0x513   : > { %v1138_v3 = vpop.xlane.xlu1 %1137 }
 0x514   : > { %1795 = vrcp.f32 %v1138_v3 }
 0x515   : > { %1797 = vrcp.f32 %v643_v16 }
 0x51a   : > { %v1792_v5 = vpop.eup %1791 }
 0x51b   : > { %v1794_v9 = vpop.eup %1793 }
 0x51e   : > { %v1796_v13 = vpop.eup %1795 }
 0x51f   : > { %v1798_v17 = vpop.eup %1797 }
 0x520   : > { %v718_v19 = vmul.f32 %v1798_v17, %v2440_v37  ;;  %v1321_v37 = vrot.slane %v1314_v29, %v1320_v36 }
 0x554   : > { %v878_v1 = vpop.f32.mrb[6].mxu1 }
 0x555   : > { %v883_v6 = vmul.f32 %v1792_v5, %v878_v1  ;;  %v1635_v7 = vpop.f32.mrb[7].mxu1 }
 0x557   : > { %1215 = vrot.lane.b32.xlu1 %v883_v6, %s2052_s27 }
 0x558   : > { %v1043_v10 = vpop.f32.mrb[8].mxu1 }
 0x559   : > { %v1048_v11 = vmul.f32 %v1794_v9, %v1043_v10  ;;  %v1645_v12 = vpop.f32.mrb[9].mxu1 }
 0x55b   : > { %1219 = vrot.lane.b32.xlu0 %v1048_v11, %s2053_s29 }
 0x55c   : > { %v1208_v0 = vpop.f32.mrb[10].mxu1 }
 0x55d   : > { %v1213_v14 = vmul.f32 %v1796_v13, %v1208_v0  ;;  %v1655_v15 = vpop.f32.mrb[11].mxu1 }
 0x55f   : > { %1223 = vrot.lane.b32.xlu1 %v1213_v14, %s2054_s9 }
 0x5c9   : > { %v1216_v18 = vpop.permute.xlu1 %1215 }
 0x5ca   : > { %v1226_v21 = vsel %vm558_vm2, %v718_v19, %v1216_v18 }
 0x5cd   : > { %v1220_v20 = vpop.permute.xlu0 %1219 }
 0x5ce   : > { %v1228_v22 = vsel %vm1227_vm3, %v1226_v21, %v1220_v20 }
 0x5d1   : > { %v1224_v23 = vpop.permute.xlu1 %1223 }
 0x5d2   : > { %v1230_v24 = vsel %vm1229_vm4, %v1228_v22, %v1224_v23 }
 0x5d3   : > { %1665 = vmatmul.mubr.msk.f32.vlgmr.msra.gmra.mrb[6].mxu0 %vm468_vm0, %v1230_v24 }
 0x6a6   : > { %v1305_v33 = vpop.f32.mrb[6].mxu0 }
 0x6a7   : > { %v1309_v34 = vadd.f32 %v1305_v33, %v1231_v32  ;;  %v1666_v35 = vpop.f32.mrb[7].mxu0 }
 0x6a9   : > { %1310 = vst.msk [vmem:[#allocation2] sm:$0xff] %vm468_vm0, %v1309_v34 }
 0x6b0   : > { %v1316_v38 = vld [vmem:[#allocation2] sm:$0xff] }
 0x6b1   : > { %v1317_v39 = vadd.f32 %v1316_v38, %v2398_v8 }
 0x6b3   : > { %v1322_v40 = vadd.f32 %v1321_v37, %v1317_v39 }
 0x6b5   : > { %v1323_v41 = vsel %vm468_vm0, %v1322_v40, 0.0 }
 0x6b6   : > { %1324 = vadd.xlane.f32.xlu1 %v1323_v41 }
 0x743   : > { %v1325_v42 = vpop.xlane.xlu1 %1324 }
 0x744   : > { %v1327_v43 = vmul.f32 0.03125, %v1325_v42 }
 0x746   : > { %v1328_v44 = vsub.f32 %v1322_v40, %v1327_v43 }
 0x748   : > { %v1329_v45 = vmul.f32 %v1328_v44, %v1328_v44 }
 0x74a   : > { %v1330_v46 = vsel %vm468_vm0, %v1329_v45, 0.0 }
 0x74b   : > { %1331 = vadd.xlane.f32.xlu0 %v1330_v46 }
 0x7d8   : > { %v1332_v47 = vpop.xlane.xlu0 %1331 }
 0x7d9   : > { %v1333_v48 = vmul.f32 0.03125, %v1332_v47 }
 0x7db   : > { %v1334_v49 = vadd.f32 1e-05, %v1333_v48 }
 0x7dd   : > { %1799 = vrsqrt.f32 %v1334_v49 }
 0x7e7   : > { %v1800_v8 = vpop.eup %1799 }
 0x7e8   : > { %v1336_v50 = vmul.f32 %v1800_v8, %v1328_v44 }
 0x7ea   : > { %v1341_v51 = vmul.f32 %v1340_v30, %v1336_v50 }
 0x7ec   : > { %v1346_v52 = vadd.f32 %v1345_v31, %v1341_v51 }
 0x7ee   : > { %1347 = vst.msk [vmem:[%s458_s20] sm:$0xff] %vm468_vm0, %v1346_v52 }
 0x7ef   : > { %1960 = shalt.err (!%p1957_p11)
}
 0x7f0   : > { %s1961_s12 = scalar_lea.hbm %s2476_s14, 128  ;;  %s1965_s19 = scalar_lea.hbm %s2600_s1, 256 }
 0x7f1   : > { %p1962_p8 = scmp.ne.s32.totalorder %s2476_s14, %s1961_s12  ;;  %p1966_p3 = scmp.lt.u32.totalorder %s2476_s14, %s2600_s1 }
 0x7f2   : > { %p1967_p13 = scmp.lt.u32.totalorder %s1965_s19, %s1961_s12  ;;  %p1969_p1 = scmp.lt.u32.totalorder %s1961_s12, %s2476_s14 }
 0x7f3   : > { %p1963_p5 = pnand %p1962_p8, %p2601_p4 }
 0x7f4   : > { %p1968_p12 = por %p1967_p13, %p1966_p3 }
 0x7f5   : > { %p1964_p9 = pneg %p1963_p5 }
 0x7f6   : > { %p1970_p0 = por %p1969_p1, %p1968_p12 }
 0x7f8   : > { %p1971_p7 = pnand %p1970_p0, %p1964_p9 }
 0x7fa   : > { %1974 = shalt.err (!%p1971_p7)
}
 0x7fb   : > { %1693 = dma.vmem_to_hbm [thread:$0]  (%p2601_p4), %s2478_s23, 128, %s2476_s14, %s1349_s13  }
 0x7fc PF: > { %s2602_s27 = sld [smem:[#allocation17_spill]]  ;;  %s2603_s29 = sld [smem:[#allocation22_spill]] }
 0x7fd   : > { %s2604_s9 = sld [smem:[#allocation20_spill]] }
 0x802   : > { %s1375_s17 = sand.u32 1, %s2602_s27   ;;  %p2605_p2 = scmp.ne.s32.totalorder %s2603_s29, 0 }
 0x803   : > { %p2606_p6 = scmp.ge.s32.totalorder %s2604_s9, 2  ;;  %s1376_s7 = scalar_lea.sflag [#allocation5], %s1375_s17 }
 0x805   : > { %p1713_p10 = pnand %p2606_p6, %p2605_p2 }
 0x807   : > { %2012 = dma.done.wait (!%p1713_p10), %s1376_s7, 128  }
 0x808   : > { %2014 = vsyncadd (!%p1713_p10), %s1376_s7, 4294967168  ;;  %s27_s29 = sadd.s32 1, %s2604_s9   ;;  %s2607_s18 = sld [smem:[#allocation18_spill]] }
 0x809   : > { %p24_p11 = scmp.ge.s32.totalorder %s27_s29, 4   ;;  %s2608_s26 = sld [smem:[#allocation24_spill]] }
 0x80a   : > { %s2609_s10 = sld [smem:[#allocation23_spill]]  ;;  %s2610_s24 = smov %s2021_s25 }
 0x80b   : > { %s2612_s27 = smov %s2033_s28  ;;  %26 = sbr.rel (!%p24_p11) target bundleno = 15 (0xf), region = 144 }
 0x80e   : > { %s2611_s25 = smov %s2607_s18 }
 0x810   : > { %s2613_s28 = smov %s2609_s10 }
 0x812   :  { %1381 = vsyncpa [#allocation4], 1 }
 0x813   :  { %1383 = vsyncpa [#allocation4 + $0x1], 1 }
 0x814   :  { %1384 = vsyncpa [#allocation7], 1 }
 0x815   :  { %1386 = vsyncpa [#allocation7 + $0x1], 1 }
 0x816   :  { %1387 = vsyncpa [#allocation10], 1 }
 0x817   :  { %1388 = vsyncpa [#allocation5], 1 }
 0x818   :  { %1390 = vsyncpa [#allocation5 + $0x1], 1 }

</bundles_post_ra>
